<compile_context>
chip_gen: v5e
topology: v5e:2x2
jax: 0.10.0
libtpu: 0.0.40
codegen_flags: <defaults>
</compile_context>

<pallas_src>
import math

import jax
import jax.numpy as jnp
from jax.experimental import pallas as pl
from jax.experimental.pallas import tpu as pltpu

# Number of overlapping DMA chunks issued by the forced-copy kernel (keeps
# several transfers in flight so the copy saturates HBM bandwidth).
_MAX_DMA_CHUNKS = 8

# Sub-byte dtypes are excluded from the copy kernel; they always take the
# (exact, metadata-only) reshape path.
_SUB_BYTE_DTYPE_NAMES = ("int4", "uint4", "int2", "uint2", "float4_e2m1fn")


def _resolve_target_shape(total_tail: int, shape) -> tuple:
    """Resolve an optional single -1 the way torch's .view does."""
    shape = tuple(int(s) for s in shape)
    if shape.count(-1) > 1:
        raise ValueError(f"only one dimension may be -1, got {shape}")
    if -1 in shape:
        idx = shape.index(-1)
        known = math.prod(s for s in shape if s != -1)
        if known <= 0 or total_tail % known != 0:
            raise ValueError(
                f"cannot infer -1 in {shape}: {total_tail} elements per batch "
                f"row is not divisible by {known}")
        shape = shape[:idx] + (total_tail // known,) + shape[idx + 1:]
    return shape


def _pick_dma_layout(total_elems: int):
    """Pick a flat (rows, width) view and a DMA chunk count for the copy.

    Prefers the widest lane-dense width (multiple of 128) that divides the
    element count, so each DMA descriptor moves long contiguous runs.  If no
    such factorization exists (rare), falls back to a single flat 1-D DMA.
    """
    for width in (8192, 4096, 2048, 1024, 512, 256, 128):
        if total_elems % width == 0:
            rows = total_elems // width
            n_chunks = _MAX_DMA_CHUNKS
            while rows % n_chunks:
                n_chunks //= 2
            return (rows, width), n_chunks
    # No multiple-of-128 factorization: one whole-array DMA (safest layout).
    return (total_elems,), 1


def _make_hbm_copy_kernel(n_chunks: int, chunk: int):
    """Kernel body: HBM→HBM copy via `n_chunks` overlapping async DMAs."""

    def kernel(x_ref, o_ref, sem):
        if n_chunks == 1:
            cp = pltpu.make_async_copy(x_ref, o_ref, sem.at[0])
            cp.start()
            cp.wait()
            return
        copies = []
        for c in range(n_chunks):
            cp = pltpu.make_async_copy(
                x_ref.at[pl.ds(c * chunk, chunk)],
                o_ref.at[pl.ds(c * chunk, chunk)],
                sem.at[c],
            )
            cp.start()
            copies.append(cp)
        for cp in copies:
            cp.wait()

    return kernel


def generic_unflatten(x: jax.Array, shape, use_kernel: bool = False) -> jax.Array:
    """Equivalent of GenericUnflatten(*shape).forward(x).

    Default: metadata-only reshape (optimal — the op is a pure view).
    use_kernel=True: force a real device-to-device copy via a Pallas
    HBM→HBM DMA kernel (for benchmarking / when a fresh buffer is wanted).
    """
    b = x.shape[0]
    total = math.prod(x.shape)
    target = _resolve_target_shape(total // b if b else 0, shape)
    out_shape = (b,) + target
    if math.prod(out_shape) != total:
        raise ValueError(f"cannot view array of shape {x.shape} as {out_shape}")

    if not use_kernel or total == 0:
        # Pure metadata change — the fastest possible implementation.
        return x.reshape(out_shape)

    if x.dtype.name in _SUB_BYTE_DTYPE_NAMES:
        # TODO(synk): sub-byte dtypes (int4/fp4) are excluded from the DMA
        # copy path; they still receive the exact reshape result.
        return x.reshape(out_shape)

    flat_shape, n_chunks = _pick_dma_layout(total)
    chunk = flat_shape[0] // n_chunks
    nbytes = total * x.dtype.itemsize
    x_flat = x.reshape(flat_shape)

    out_flat = pl.pallas_call(
        _make_hbm_copy_kernel(n_chunks, chunk),
        out_shape=jax.ShapeDtypeStruct(flat_shape, x.dtype),
        in_specs=[pl.BlockSpec(memory_space=pl.ANY)],
        out_specs=pl.BlockSpec(memory_space=pl.ANY),
        scratch_shapes=[pltpu.SemaphoreType.DMA((n_chunks,))],
        cost_estimate=pl.CostEstimate(
            flops=0, transcendentals=0, bytes_accessed=2 * nbytes),
    )(x_flat)

    # Trailing reshape to the requested view is metadata-only.
    return out_flat.reshape(out_shape)


if __name__ == "__main__":
    key = jax.random.PRNGKey(0)

    # Case 1: GenericUnflatten(4, 16, 16), batch=2 -> default (reshape) path.
    batch = 2
    target_shape = (4, 16, 16)
    x_small = jax.random.normal(key, (batch, 4 * 16 * 16), dtype=jnp.float32)
    out_small = jax.block_until_ready(generic_unflatten(x_small, target_shape))
    assert out_small.shape == (batch,) + target_shape, out_small.shape
    assert out_small.dtype == x_small.dtype
    assert jnp.array_equal(out_small.reshape(x_small.shape), x_small)

    # Case 2: forced HBM->HBM DMA copy kernel (lane-dense 2-D layout, 8 chunks).
    key2 = jax.random.fold_in(key, 1)
    x_big = jax.random.normal(key2, (16, 4096), dtype=jnp.float32)
    out_big = jax.block_until_ready(
        generic_unflatten(x_big, (4, 32, 32), use_kernel=True))
    assert out_big.shape == (16, 4, 32, 32), out_big.shape
    assert out_big.dtype == x_big.dtype
    assert jnp.array_equal(out_big.reshape(x_big.shape), x_big)

    # Case 3: forced kernel where the element count has no multiple-of-128
    # factor (exercises the single whole-array DMA fallback) plus a -1 dim.
    key3 = jax.random.fold_in(key, 2)
    x_odd = jax.random.normal(key3, (2, 45), dtype=jnp.float32)
    out_odd = jax.block_until_ready(
        generic_unflatten(x_odd, (9, -1), use_kernel=True))
    assert out_odd.shape == (2, 9, 5), out_odd.shape
    assert jnp.array_equal(out_odd.reshape(x_odd.shape), x_odd)

    print("KERNEL_OK")
</pallas_src>

<mosaic_0001>
module attributes {stable_mosaic.version = 11 : i64} {
  func.func @kernel(%arg0: memref<8x8192xf32, #tpu.memory_space<any>>, %arg1: memref<8x8192xf32, #tpu.memory_space<any>>, %arg2: memref<8x!tpu.dma_semaphore, #tpu.memory_space<semaphore_mem>>) attributes {dimension_semantics = [], scalar_prefetch = 0 : i64, scratch_operands = 1 : i64, tpu.core_type = #tpu.core_type<tc>} {
    %c0_i32 = arith.constant 0 : i32
    %c0_i32_0 = arith.constant 0 : i32
    %c0_i32_1 = arith.constant 0 : i32
    %0 = tpu.memref_slice %arg0[%c0_i32_0, %c0_i32_1] : memref<8x8192xf32, #tpu.memory_space<any>> -> memref<1x8192xf32, #tpu.memory_space<any>>
    %c0_i32_2 = arith.constant 0 : i32
    %c0_i32_3 = arith.constant 0 : i32
    %1 = tpu.memref_slice %arg1[%c0_i32_2, %c0_i32_3] : memref<8x8192xf32, #tpu.memory_space<any>> -> memref<1x8192xf32, #tpu.memory_space<any>>
    %2 = tpu.memref_slice %arg2[%c0_i32] : memref<8x!tpu.dma_semaphore, #tpu.memory_space<semaphore_mem>> -> memref<1x!tpu.dma_semaphore, #tpu.memory_space<semaphore_mem>>
    %3 = tpu.memref_squeeze %2 : memref<1x!tpu.dma_semaphore, #tpu.memory_space<semaphore_mem>> -> memref<!tpu.dma_semaphore, #tpu.memory_space<semaphore_mem>>
    tpu.enqueue_dma source(%0 : memref<1x8192xf32, #tpu.memory_space<any>>) target(%1 : memref<1x8192xf32, #tpu.memory_space<any>>) target_semaphore(%3 : memref<!tpu.dma_semaphore, #tpu.memory_space<semaphore_mem>>)
    %c1_i32 = arith.constant 1 : i32
    %c1_i32_4 = arith.constant 1 : i32
    %c0_i32_5 = arith.constant 0 : i32
    %4 = tpu.memref_slice %arg0[%c1_i32_4, %c0_i32_5] : memref<8x8192xf32, #tpu.memory_space<any>> -> memref<1x8192xf32, #tpu.memory_space<any>>
    %c1_i32_6 = arith.constant 1 : i32
    %c0_i32_7 = arith.constant 0 : i32
    %5 = tpu.memref_slice %arg1[%c1_i32_6, %c0_i32_7] : memref<8x8192xf32, #tpu.memory_space<any>> -> memref<1x8192xf32, #tpu.memory_space<any>>
    %6 = tpu.memref_slice %arg2[%c1_i32] : memref<8x!tpu.dma_semaphore, #tpu.memory_space<semaphore_mem>> -> memref<1x!tpu.dma_semaphore, #tpu.memory_space<semaphore_mem>>
    %7 = tpu.memref_squeeze %6 : memref<1x!tpu.dma_semaphore, #tpu.memory_space<semaphore_mem>> -> memref<!tpu.dma_semaphore, #tpu.memory_space<semaphore_mem>>
    tpu.enqueue_dma source(%4 : memref<1x8192xf32, #tpu.memory_space<any>>) target(%5 : memref<1x8192xf32, #tpu.memory_space<any>>) target_semaphore(%7 : memref<!tpu.dma_semaphore, #tpu.memory_space<semaphore_mem>>)
    %c2_i32 = arith.constant 2 : i32
    %c2_i32_8 = arith.constant 2 : i32
    %c0_i32_9 = arith.constant 0 : i32
    %8 = tpu.memref_slice %arg0[%c2_i32_8, %c0_i32_9] : memref<8x8192xf32, #tpu.memory_space<any>> -> memref<1x8192xf32, #tpu.memory_space<any>>
    %c2_i32_10 = arith.constant 2 : i32
    %c0_i32_11 = arith.constant 0 : i32
    %9 = tpu.memref_slice %arg1[%c2_i32_10, %c0_i32_11] : memref<8x8192xf32, #tpu.memory_space<any>> -> memref<1x8192xf32, #tpu.memory_space<any>>
    %10 = tpu.memref_slice %arg2[%c2_i32] : memref<8x!tpu.dma_semaphore, #tpu.memory_space<semaphore_mem>> -> memref<1x!tpu.dma_semaphore, #tpu.memory_space<semaphore_mem>>
    %11 = tpu.memref_squeeze %10 : memref<1x!tpu.dma_semaphore, #tpu.memory_space<semaphore_mem>> -> memref<!tpu.dma_semaphore, #tpu.memory_space<semaphore_mem>>
    tpu.enqueue_dma source(%8 : memref<1x8192xf32, #tpu.memory_space<any>>) target(%9 : memref<1x8192xf32, #tpu.memory_space<any>>) target_semaphore(%11 : memref<!tpu.dma_semaphore, #tpu.memory_space<semaphore_mem>>)
    %c3_i32 = arith.constant 3 : i32
    %c3_i32_12 = arith.constant 3 : i32
    %c0_i32_13 = arith.constant 0 : i32
    %12 = tpu.memref_slice %arg0[%c3_i32_12, %c0_i32_13] : memref<8x8192xf32, #tpu.memory_space<any>> -> memref<1x8192xf32, #tpu.memory_space<any>>
    %c3_i32_14 = arith.constant 3 : i32
    %c0_i32_15 = arith.constant 0 : i32
    %13 = tpu.memref_slice %arg1[%c3_i32_14, %c0_i32_15] : memref<8x8192xf32, #tpu.memory_space<any>> -> memref<1x8192xf32, #tpu.memory_space<any>>
    %14 = tpu.memref_slice %arg2[%c3_i32] : memref<8x!tpu.dma_semaphore, #tpu.memory_space<semaphore_mem>> -> memref<1x!tpu.dma_semaphore, #tpu.memory_space<semaphore_mem>>
    %15 = tpu.memref_squeeze %14 : memref<1x!tpu.dma_semaphore, #tpu.memory_space<semaphore_mem>> -> memref<!tpu.dma_semaphore, #tpu.memory_space<semaphore_mem>>
    tpu.enqueue_dma source(%12 : memref<1x8192xf32, #tpu.memory_space<any>>) target(%13 : memref<1x8192xf32, #tpu.memory_space<any>>) target_semaphore(%15 : memref<!tpu.dma_semaphore, #tpu.memory_space<semaphore_mem>>)
    %c4_i32 = arith.constant 4 : i32
    %c4_i32_16 = arith.constant 4 : i32
    %c0_i32_17 = arith.constant 0 : i32
    %16 = tpu.memref_slice %arg0[%c4_i32_16, %c0_i32_17] : memref<8x8192xf32, #tpu.memory_space<any>> -> memref<1x8192xf32, #tpu.memory_space<any>>
    %c4_i32_18 = arith.constant 4 : i32
    %c0_i32_19 = arith.constant 0 : i32
    %17 = tpu.memref_slice %arg1[%c4_i32_18, %c0_i32_19] : memref<8x8192xf32, #tpu.memory_space<any>> -> memref<1x8192xf32, #tpu.memory_space<any>>
    %18 = tpu.memref_slice %arg2[%c4_i32] : memref<8x!tpu.dma_semaphore, #tpu.memory_space<semaphore_mem>> -> memref<1x!tpu.dma_semaphore, #tpu.memory_space<semaphore_mem>>
    %19 = tpu.memref_squeeze %18 : memref<1x!tpu.dma_semaphore, #tpu.memory_space<semaphore_mem>> -> memref<!tpu.dma_semaphore, #tpu.memory_space<semaphore_mem>>
    tpu.enqueue_dma source(%16 : memref<1x8192xf32, #tpu.memory_space<any>>) target(%17 : memref<1x8192xf32, #tpu.memory_space<any>>) target_semaphore(%19 : memref<!tpu.dma_semaphore, #tpu.memory_space<semaphore_mem>>)
    %c5_i32 = arith.constant 5 : i32
    %c5_i32_20 = arith.constant 5 : i32
    %c0_i32_21 = arith.constant 0 : i32
    %20 = tpu.memref_slice %arg0[%c5_i32_20, %c0_i32_21] : memref<8x8192xf32, #tpu.memory_space<any>> -> memref<1x8192xf32, #tpu.memory_space<any>>
    %c5_i32_22 = arith.constant 5 : i32
    %c0_i32_23 = arith.constant 0 : i32
    %21 = tpu.memref_slice %arg1[%c5_i32_22, %c0_i32_23] : memref<8x8192xf32, #tpu.memory_space<any>> -> memref<1x8192xf32, #tpu.memory_space<any>>
    %22 = tpu.memref_slice %arg2[%c5_i32] : memref<8x!tpu.dma_semaphore, #tpu.memory_space<semaphore_mem>> -> memref<1x!tpu.dma_semaphore, #tpu.memory_space<semaphore_mem>>
    %23 = tpu.memref_squeeze %22 : memref<1x!tpu.dma_semaphore, #tpu.memory_space<semaphore_mem>> -> memref<!tpu.dma_semaphore, #tpu.memory_space<semaphore_mem>>
    tpu.enqueue_dma source(%20 : memref<1x8192xf32, #tpu.memory_space<any>>) target(%21 : memref<1x8192xf32, #tpu.memory_space<any>>) target_semaphore(%23 : memref<!tpu.dma_semaphore, #tpu.memory_space<semaphore_mem>>)
    %c6_i32 = arith.constant 6 : i32
    %c6_i32_24 = arith.constant 6 : i32
    %c0_i32_25 = arith.constant 0 : i32
    %24 = tpu.memref_slice %arg0[%c6_i32_24, %c0_i32_25] : memref<8x8192xf32, #tpu.memory_space<any>> -> memref<1x8192xf32, #tpu.memory_space<any>>
    %c6_i32_26 = arith.constant 6 : i32
    %c0_i32_27 = arith.constant 0 : i32
    %25 = tpu.memref_slice %arg1[%c6_i32_26, %c0_i32_27] : memref<8x8192xf32, #tpu.memory_space<any>> -> memref<1x8192xf32, #tpu.memory_space<any>>
    %26 = tpu.memref_slice %arg2[%c6_i32] : memref<8x!tpu.dma_semaphore, #tpu.memory_space<semaphore_mem>> -> memref<1x!tpu.dma_semaphore, #tpu.memory_space<semaphore_mem>>
    %27 = tpu.memref_squeeze %26 : memref<1x!tpu.dma_semaphore, #tpu.memory_space<semaphore_mem>> -> memref<!tpu.dma_semaphore, #tpu.memory_space<semaphore_mem>>
    tpu.enqueue_dma source(%24 : memref<1x8192xf32, #tpu.memory_space<any>>) target(%25 : memref<1x8192xf32, #tpu.memory_space<any>>) target_semaphore(%27 : memref<!tpu.dma_semaphore, #tpu.memory_space<semaphore_mem>>)
    %c7_i32 = arith.constant 7 : i32
    %c7_i32_28 = arith.constant 7 : i32
    %c0_i32_29 = arith.constant 0 : i32
    %28 = tpu.memref_slice %arg0[%c7_i32_28, %c0_i32_29] : memref<8x8192xf32, #tpu.memory_space<any>> -> memref<1x8192xf32, #tpu.memory_space<any>>
    %c7_i32_30 = arith.constant 7 : i32
    %c0_i32_31 = arith.constant 0 : i32
    %29 = tpu.memref_slice %arg1[%c7_i32_30, %c0_i32_31] : memref<8x8192xf32, #tpu.memory_space<any>> -> memref<1x8192xf32, #tpu.memory_space<any>>
    %30 = tpu.memref_slice %arg2[%c7_i32] : memref<8x!tpu.dma_semaphore, #tpu.memory_space<semaphore_mem>> -> memref<1x!tpu.dma_semaphore, #tpu.memory_space<semaphore_mem>>
    %31 = tpu.memref_squeeze %30 : memref<1x!tpu.dma_semaphore, #tpu.memory_space<semaphore_mem>> -> memref<!tpu.dma_semaphore, #tpu.memory_space<semaphore_mem>>
    tpu.enqueue_dma source(%28 : memref<1x8192xf32, #tpu.memory_space<any>>) target(%29 : memref<1x8192xf32, #tpu.memory_space<any>>) target_semaphore(%31 : memref<!tpu.dma_semaphore, #tpu.memory_space<semaphore_mem>>)
    %c0_i32_32 = arith.constant 0 : i32
    %c0_i32_33 = arith.constant 0 : i32
    %c0_i32_34 = arith.constant 0 : i32
    %32 = tpu.memref_slice %arg0[%c0_i32_33, %c0_i32_34] : memref<8x8192xf32, #tpu.memory_space<any>> -> memref<1x8192xf32, #tpu.memory_space<any>>
    %c0_i32_35 = arith.constant 0 : i32
    %c0_i32_36 = arith.constant 0 : i32
    %33 = tpu.memref_slice %arg1[%c0_i32_35, %c0_i32_36] : memref<8x8192xf32, #tpu.memory_space<any>> -> memref<1x8192xf32, #tpu.memory_space<any>>
    %34 = tpu.memref_slice %arg2[%c0_i32_32] : memref<8x!tpu.dma_semaphore, #tpu.memory_space<semaphore_mem>> -> memref<1x!tpu.dma_semaphore, #tpu.memory_space<semaphore_mem>>
    %35 = tpu.memref_squeeze %34 : memref<1x!tpu.dma_semaphore, #tpu.memory_space<semaphore_mem>> -> memref<!tpu.dma_semaphore, #tpu.memory_space<semaphore_mem>>
    tpu.wait_dma2 semaphore(%35 : memref<!tpu.dma_semaphore, #tpu.memory_space<semaphore_mem>>) src(%32 : memref<1x8192xf32, #tpu.memory_space<any>>) dst(%33 : memref<1x8192xf32, #tpu.memory_space<any>>)
    %c1_i32_37 = arith.constant 1 : i32
    %c1_i32_38 = arith.constant 1 : i32
    %c0_i32_39 = arith.constant 0 : i32
    %36 = tpu.memref_slice %arg0[%c1_i32_38, %c0_i32_39] : memref<8x8192xf32, #tpu.memory_space<any>> -> memref<1x8192xf32, #tpu.memory_space<any>>
    %c1_i32_40 = arith.constant 1 : i32
    %c0_i32_41 = arith.constant 0 : i32
    %37 = tpu.memref_slice %arg1[%c1_i32_40, %c0_i32_41] : memref<8x8192xf32, #tpu.memory_space<any>> -> memref<1x8192xf32, #tpu.memory_space<any>>
    %38 = tpu.memref_slice %arg2[%c1_i32_37] : memref<8x!tpu.dma_semaphore, #tpu.memory_space<semaphore_mem>> -> memref<1x!tpu.dma_semaphore, #tpu.memory_space<semaphore_mem>>
    %39 = tpu.memref_squeeze %38 : memref<1x!tpu.dma_semaphore, #tpu.memory_space<semaphore_mem>> -> memref<!tpu.dma_semaphore, #tpu.memory_space<semaphore_mem>>
    tpu.wait_dma2 semaphore(%39 : memref<!tpu.dma_semaphore, #tpu.memory_space<semaphore_mem>>) src(%36 : memref<1x8192xf32, #tpu.memory_space<any>>) dst(%37 : memref<1x8192xf32, #tpu.memory_space<any>>)
    %c2_i32_42 = arith.constant 2 : i32
    %c2_i32_43 = arith.constant 2 : i32
    %c0_i32_44 = arith.constant 0 : i32
    %40 = tpu.memref_slice %arg0[%c2_i32_43, %c0_i32_44] : memref<8x8192xf32, #tpu.memory_space<any>> -> memref<1x8192xf32, #tpu.memory_space<any>>
    %c2_i32_45 = arith.constant 2 : i32
    %c0_i32_46 = arith.constant 0 : i32
    %41 = tpu.memref_slice %arg1[%c2_i32_45, %c0_i32_46] : memref<8x8192xf32, #tpu.memory_space<any>> -> memref<1x8192xf32, #tpu.memory_space<any>>
    %42 = tpu.memref_slice %arg2[%c2_i32_42] : memref<8x!tpu.dma_semaphore, #tpu.memory_space<semaphore_mem>> -> memref<1x!tpu.dma_semaphore, #tpu.memory_space<semaphore_mem>>
    %43 = tpu.memref_squeeze %42 : memref<1x!tpu.dma_semaphore, #tpu.memory_space<semaphore_mem>> -> memref<!tpu.dma_semaphore, #tpu.memory_space<semaphore_mem>>
    tpu.wait_dma2 semaphore(%43 : memref<!tpu.dma_semaphore, #tpu.memory_space<semaphore_mem>>) src(%40 : memref<1x8192xf32, #tpu.memory_space<any>>) dst(%41 : memref<1x8192xf32, #tpu.memory_space<any>>)
    %c3_i32_47 = arith.constant 3 : i32
    %c3_i32_48 = arith.constant 3 : i32
    %c0_i32_49 = arith.constant 0 : i32
    %44 = tpu.memref_slice %arg0[%c3_i32_48, %c0_i32_49] : memref<8x8192xf32, #tpu.memory_space<any>> -> memref<1x8192xf32, #tpu.memory_space<any>>
    %c3_i32_50 = arith.constant 3 : i32
    %c0_i32_51 = arith.constant 0 : i32
    %45 = tpu.memref_slice %arg1[%c3_i32_50, %c0_i32_51] : memref<8x8192xf32, #tpu.memory_space<any>> -> memref<1x8192xf32, #tpu.memory_space<any>>
    %46 = tpu.memref_slice %arg2[%c3_i32_47] : memref<8x!tpu.dma_semaphore, #tpu.memory_space<semaphore_mem>> -> memref<1x!tpu.dma_semaphore, #tpu.memory_space<semaphore_mem>>
    %47 = tpu.memref_squeeze %46 : memref<1x!tpu.dma_semaphore, #tpu.memory_space<semaphore_mem>> -> memref<!tpu.dma_semaphore, #tpu.memory_space<semaphore_mem>>
    tpu.wait_dma2 semaphore(%47 : memref<!tpu.dma_semaphore, #tpu.memory_space<semaphore_mem>>) src(%44 : memref<1x8192xf32, #tpu.memory_space<any>>) dst(%45 : memref<1x8192xf32, #tpu.memory_space<any>>)
    %c4_i32_52 = arith.constant 4 : i32
    %c4_i32_53 = arith.constant 4 : i32
    %c0_i32_54 = arith.constant 0 : i32
    %48 = tpu.memref_slice %arg0[%c4_i32_53, %c0_i32_54] : memref<8x8192xf32, #tpu.memory_space<any>> -> memref<1x8192xf32, #tpu.memory_space<any>>
    %c4_i32_55 = arith.constant 4 : i32
    %c0_i32_56 = arith.constant 0 : i32
    %49 = tpu.memref_slice %arg1[%c4_i32_55, %c0_i32_56] : memref<8x8192xf32, #tpu.memory_space<any>> -> memref<1x8192xf32, #tpu.memory_space<any>>
    %50 = tpu.memref_slice %arg2[%c4_i32_52] : memref<8x!tpu.dma_semaphore, #tpu.memory_space<semaphore_mem>> -> memref<1x!tpu.dma_semaphore, #tpu.memory_space<semaphore_mem>>
    %51 = tpu.memref_squeeze %50 : memref<1x!tpu.dma_semaphore, #tpu.memory_space<semaphore_mem>> -> memref<!tpu.dma_semaphore, #tpu.memory_space<semaphore_mem>>
    tpu.wait_dma2 semaphore(%51 : memref<!tpu.dma_semaphore, #tpu.memory_space<semaphore_mem>>) src(%48 : memref<1x8192xf32, #tpu.memory_space<any>>) dst(%49 : memref<1x8192xf32, #tpu.memory_space<any>>)
    %c5_i32_57 = arith.constant 5 : i32
    %c5_i32_58 = arith.constant 5 : i32
    %c0_i32_59 = arith.constant 0 : i32
    %52 = tpu.memref_slice %arg0[%c5_i32_58, %c0_i32_59] : memref<8x8192xf32, #tpu.memory_space<any>> -> memref<1x8192xf32, #tpu.memory_space<any>>
    %c5_i32_60 = arith.constant 5 : i32
    %c0_i32_61 = arith.constant 0 : i32
    %53 = tpu.memref_slice %arg1[%c5_i32_60, %c0_i32_61] : memref<8x8192xf32, #tpu.memory_space<any>> -> memref<1x8192xf32, #tpu.memory_space<any>>
    %54 = tpu.memref_slice %arg2[%c5_i32_57] : memref<8x!tpu.dma_semaphore, #tpu.memory_space<semaphore_mem>> -> memref<1x!tpu.dma_semaphore, #tpu.memory_space<semaphore_mem>>
    %55 = tpu.memref_squeeze %54 : memref<1x!tpu.dma_semaphore, #tpu.memory_space<semaphore_mem>> -> memref<!tpu.dma_semaphore, #tpu.memory_space<semaphore_mem>>
    tpu.wait_dma2 semaphore(%55 : memref<!tpu.dma_semaphore, #tpu.memory_space<semaphore_mem>>) src(%52 : memref<1x8192xf32, #tpu.memory_space<any>>) dst(%53 : memref<1x8192xf32, #tpu.memory_space<any>>)
    %c6_i32_62 = arith.constant 6 : i32
    %c6_i32_63 = arith.constant 6 : i32
    %c0_i32_64 = arith.constant 0 : i32
    %56 = tpu.memref_slice %arg0[%c6_i32_63, %c0_i32_64] : memref<8x8192xf32, #tpu.memory_space<any>> -> memref<1x8192xf32, #tpu.memory_space<any>>
    %c6_i32_65 = arith.constant 6 : i32
    %c0_i32_66 = arith.constant 0 : i32
    %57 = tpu.memref_slice %arg1[%c6_i32_65, %c0_i32_66] : memref<8x8192xf32, #tpu.memory_space<any>> -> memref<1x8192xf32, #tpu.memory_space<any>>
    %58 = tpu.memref_slice %arg2[%c6_i32_62] : memref<8x!tpu.dma_semaphore, #tpu.memory_space<semaphore_mem>> -> memref<1x!tpu.dma_semaphore, #tpu.memory_space<semaphore_mem>>
    %59 = tpu.memref_squeeze %58 : memref<1x!tpu.dma_semaphore, #tpu.memory_space<semaphore_mem>> -> memref<!tpu.dma_semaphore, #tpu.memory_space<semaphore_mem>>
    tpu.wait_dma2 semaphore(%59 : memref<!tpu.dma_semaphore, #tpu.memory_space<semaphore_mem>>) src(%56 : memref<1x8192xf32, #tpu.memory_space<any>>) dst(%57 : memref<1x8192xf32, #tpu.memory_space<any>>)
    %c7_i32_67 = arith.constant 7 : i32
    %c7_i32_68 = arith.constant 7 : i32
    %c0_i32_69 = arith.constant 0 : i32
    %60 = tpu.memref_slice %arg0[%c7_i32_68, %c0_i32_69] : memref<8x8192xf32, #tpu.memory_space<any>> -> memref<1x8192xf32, #tpu.memory_space<any>>
    %c7_i32_70 = arith.constant 7 : i32
    %c0_i32_71 = arith.constant 0 : i32
    %61 = tpu.memref_slice %arg1[%c7_i32_70, %c0_i32_71] : memref<8x8192xf32, #tpu.memory_space<any>> -> memref<1x8192xf32, #tpu.memory_space<any>>
    %62 = tpu.memref_slice %arg2[%c7_i32_67] : memref<8x!tpu.dma_semaphore, #tpu.memory_space<semaphore_mem>> -> memref<1x!tpu.dma_semaphore, #tpu.memory_space<semaphore_mem>>
    %63 = tpu.memref_squeeze %62 : memref<1x!tpu.dma_semaphore, #tpu.memory_space<semaphore_mem>> -> memref<!tpu.dma_semaphore, #tpu.memory_space<semaphore_mem>>
    tpu.wait_dma2 semaphore(%63 : memref<!tpu.dma_semaphore, #tpu.memory_space<semaphore_mem>>) src(%60 : memref<1x8192xf32, #tpu.memory_space<any>>) dst(%61 : memref<1x8192xf32, #tpu.memory_space<any>>)
    return
  }
}

</mosaic_0001>

<bundles_post_ra>
// kernel: tpu_custom_call.1
= control target key start
LH: loop header
LB: loop body
LE: loop exit
PB: predicated region body
PF: predicated region fallthrough
CT: control target
= control target key end

     0   :  { %s286_s12 = smov 128   ;;  %s287_s13 = smov 1   ;;  %s395_s0 = inlined_call_operand.hbm [shape: f32[8,8192], index: 0, kind: input, shape index: {}]   ;;  %s396_s1 = inlined_call_operand.hbm [shape: f32[8,8192], index: 1, kind: output, shape index: {}]  }
   0x1   :  { %s10_s8 = sshll.u32 %s395_s0, 4  ;;  %s12_s11 = sshll.u32 %s396_s1, 4  ;;  %s11_s8 = int_to_ptr.hbm [resolvable:$true] %s10_s8  ;;  %s13_s11 = int_to_ptr.hbm [resolvable:$true] %s12_s11 }
   0x2   :  { %17 = sst [smem:[#allocation4]] %s286_s12  ;;  %s288_s14 = smov [#allocation2]  }
   0x3   :  { %19 = sst [smem:[#allocation4 + $0x1]] %s286_s12  ;;  %s289_s15 = smov [#allocation3]  }
   0x4   :  { %21 = sst [smem:[#allocation4 + $0x2]] %s287_s13  ;;  %s290_s16 = smov 0  }
   0x5   :  { %23 = dma.general %s11_s8, 1024, %s13_s11, %s288_s14, %s289_s15, [#allocation4], %s290_s16, 0  }
   0x6   :  { %38 = sst [smem:[#allocation6]] %s286_s12  ;;  %s24_s19 = scalar_lea.hbm %s395_s0, 1 }
   0x7   :  { %40 = sst [smem:[#allocation6 + $0x1]] %s286_s12  ;;  %s25_s22 = scalar_lea.hbm %s396_s1, 1 }
   0x8   :  { %42 = sst [smem:[#allocation6 + $0x2]] %s287_s13  ;;  %s31_s23 = sshll.u32 %s24_s19, 4  ;;  %s32_s23 = int_to_ptr.hbm [resolvable:$true] %s31_s23 }
   0x9   :  { %s33_s24 = sshll.u32 %s25_s22, 4  ;;  %s45_s27 = scalar_lea.hbm %s395_s0, 2  ;;  %s34_s24 = int_to_ptr.hbm [resolvable:$true] %s33_s24 }
   0xa   :  { %s291_s28 = smov [#allocation2 + $0x1]   ;;  %s292_s29 = smov [#allocation5]  }
   0xb   :  { %44 = dma.general %s32_s23, 1024, %s34_s24, %s291_s28, %s292_s29, [#allocation6], %s290_s16, 0  }
   0xc   :  { %59 = sst [smem:[#allocation8]] %s286_s12  ;;  %s46_s3 = scalar_lea.hbm %s396_s1, 2 }
   0xd   :  { %61 = sst [smem:[#allocation8 + $0x1]] %s286_s12  ;;  %s52_s4 = sshll.u32 %s45_s27, 4  ;;  %s53_s4 = int_to_ptr.hbm [resolvable:$true] %s52_s4 }
   0xe   :  { %63 = sst [smem:[#allocation8 + $0x2]] %s287_s13  ;;  %s54_s5 = sshll.u32 %s46_s3, 4  ;;  %s55_s5 = int_to_ptr.hbm [resolvable:$true] %s54_s5 }
   0xf   :  { %s293_s6 = smov [#allocation2 + $0x2]   ;;  %s294_s7 = smov [#allocation7]  }
  0x10   :  { %65 = dma.general %s53_s4, 1024, %s55_s5, %s293_s6, %s294_s7, [#allocation8], %s290_s16, 0  }
  0x11   :  { %80 = sst [smem:[#allocation10]] %s286_s12  ;;  %s66_s10 = scalar_lea.hbm %s395_s0, 3 }
  0x12   :  { %82 = sst [smem:[#allocation10 + $0x1]] %s286_s12  ;;  %s67_s15 = scalar_lea.hbm %s396_s1, 3 }
  0x13   :  { %84 = sst [smem:[#allocation10 + $0x2]] %s287_s13  ;;  %s73_s17 = sshll.u32 %s66_s10, 4  ;;  %s74_s17 = int_to_ptr.hbm [resolvable:$true] %s73_s17 }
  0x14   :  { %s75_s18 = sshll.u32 %s67_s15, 4  ;;  %s87_s21 = scalar_lea.hbm %s395_s0, 4  ;;  %s76_s18 = int_to_ptr.hbm [resolvable:$true] %s75_s18 }
  0x15   :  { %s295_s22 = smov [#allocation2 + $0x3]   ;;  %s296_s23 = smov [#allocation9]  }
  0x16   :  { %86 = dma.general %s74_s17, 1024, %s76_s18, %s295_s22, %s296_s23, [#allocation10], %s290_s16, 0  }
  0x17   :  { %101 = sst [smem:[#allocation12]] %s286_s12  ;;  %s88_s26 = scalar_lea.hbm %s396_s1, 4 }
  0x18   :  { %103 = sst [smem:[#allocation12 + $0x1]] %s286_s12  ;;  %s94_s27 = sshll.u32 %s87_s21, 4  ;;  %s95_s27 = int_to_ptr.hbm [resolvable:$true] %s94_s27 }
  0x19   :  { %105 = sst [smem:[#allocation12 + $0x2]] %s287_s13  ;;  %s96_s28 = sshll.u32 %s88_s26, 4  ;;  %s97_s28 = int_to_ptr.hbm [resolvable:$true] %s96_s28 }
  0x1a   :  { %s297_s29 = smov [#allocation2 + $0x4]   ;;  %s298_s30 = smov [#allocation11]  }
  0x1b   :  { %107 = dma.general %s95_s27, 1024, %s97_s28, %s297_s29, %s298_s30, [#allocation12], %s290_s16, 0  }
  0x1c   :  { %122 = sst [smem:[#allocation14]] %s286_s12  ;;  %s108_s4 = scalar_lea.hbm %s395_s0, 5 }
  0x1d   :  { %124 = sst [smem:[#allocation14 + $0x1]] %s286_s12  ;;  %s109_s7 = scalar_lea.hbm %s396_s1, 5 }
  0x1e   :  { %126 = sst [smem:[#allocation14 + $0x2]] %s287_s13  ;;  %s115_s8 = sshll.u32 %s108_s4, 4  ;;  %s116_s8 = int_to_ptr.hbm [resolvable:$true] %s115_s8 }
  0x1f   :  { %s117_s9 = sshll.u32 %s109_s7, 4  ;;  %s129_s14 = scalar_lea.hbm %s395_s0, 6  ;;  %s118_s9 = int_to_ptr.hbm [resolvable:$true] %s117_s9 }
  0x20   :  { %s299_s15 = smov [#allocation2 + $0x5]   ;;  %s300_s17 = smov [#allocation13]  }
  0x21   :  { %128 = dma.general %s116_s8, 1024, %s118_s9, %s299_s15, %s300_s17, [#allocation14], %s290_s16, 0  }
  0x22   :  { %143 = sst [smem:[#allocation16]] %s286_s12  ;;  %s130_s20 = scalar_lea.hbm %s396_s1, 6 }
  0x23   :  { %145 = sst [smem:[#allocation16 + $0x1]] %s286_s12  ;;  %s136_s21 = sshll.u32 %s129_s14, 4  ;;  %s137_s21 = int_to_ptr.hbm [resolvable:$true] %s136_s21 }
  0x24   :  { %147 = sst [smem:[#allocation16 + $0x2]] %s287_s13  ;;  %s138_s22 = sshll.u32 %s130_s20, 4  ;;  %s139_s22 = int_to_ptr.hbm [resolvable:$true] %s138_s22 }
  0x25   :  { %s301_s23 = smov [#allocation2 + $0x6]   ;;  %s302_s24 = smov [#allocation15]  }
  0x26   :  { %149 = dma.general %s137_s21, 1024, %s139_s22, %s301_s23, %s302_s24, [#allocation16], %s290_s16, 0  }
  0x27   :  { %164 = sst [smem:[#allocation18]] %s286_s12  ;;  %s150_s27 = scalar_lea.hbm %s395_s0, 7 }
  0x28   :  { %166 = sst [smem:[#allocation18 + $0x1]] %s286_s12  ;;  %s151_s30 = scalar_lea.hbm %s396_s1, 7 }
  0x29   :  { %168 = sst [smem:[#allocation18 + $0x2]] %s287_s13  ;;  %s157_s2 = sshll.u32 %s150_s27, 4  ;;  %s158_s2 = int_to_ptr.hbm [resolvable:$true] %s157_s2 }
  0x2a   :  { %s159_s3 = sshll.u32 %s151_s30, 4  ;;  %s303_s4 = smov [#allocation2 + $0x7]   ;;  %s160_s3 = int_to_ptr.hbm [resolvable:$true] %s159_s3 }
  0x2b   :  { %s304_s5 = smov [#allocation17]  }
  0x2c   :  { %170 = dma.general %s158_s2, 1024, %s160_s3, %s303_s4, %s304_s5, [#allocation18], %s290_s16, 0  }
  0x2d   :  { %270 = dma.done.wait [#allocation2], 1024 }
  0x2e   :  { %271 = vsyncadd [#allocation2], 4294966272 }
  0x2f   :  { %272 = dma.done.wait [#allocation2 + $0x1], 1024 }
  0x30   :  { %273 = vsyncadd [#allocation2 + $0x1], 4294966272 }
  0x31   :  { %274 = dma.done.wait [#allocation2 + $0x2], 1024 }
  0x32   :  { %275 = vsyncadd [#allocation2 + $0x2], 4294966272 }
  0x33   :  { %276 = dma.done.wait [#allocation2 + $0x3], 1024 }
  0x34   :  { %277 = vsyncadd [#allocation2 + $0x3], 4294966272 }
  0x35   :  { %278 = dma.done.wait [#allocation2 + $0x4], 1024 }
  0x36   :  { %279 = vsyncadd [#allocation2 + $0x4], 4294966272 }
  0x37   :  { %280 = dma.done.wait [#allocation2 + $0x5], 1024 }
  0x38   :  { %281 = vsyncadd [#allocation2 + $0x5], 4294966272 }
  0x39   :  { %282 = dma.done.wait [#allocation2 + $0x6], 1024 }
  0x3a   :  { %283 = vsyncadd [#allocation2 + $0x6], 4294966272 }
  0x3b   :  { %284 = dma.done.wait [#allocation2 + $0x7], 1024 }
  0x3c   :  { %285 = vsyncadd [#allocation2 + $0x7], 4294966272 }
  0x3d   :  { %188 = vsyncmov [#allocation2] }
  0x40   :  { %s189_s0 = vpop.sfrf %188 }
  0x41   :  { %p243_p0 = scmp.ne.s32.totalorder %s189_s0, 0 }
  0x43   :  { %193 = shalt.err (%p243_p0)  }
  0x44   :  { %195 = vsyncmov [#allocation2 + $0x1] }
  0x47   :  { %s196_s1 = vpop.sfrf %195 }
  0x48   :  { %p244_p1 = scmp.ne.s32.totalorder %s196_s1, 0 }
  0x4a   :  { %200 = shalt.err (%p244_p1)  }
  0x4b   :  { %202 = vsyncmov [#allocation2 + $0x2] }
  0x4e   :  { %s203_s12 = vpop.sfrf %202 }
  0x4f   :  { %p245_p2 = scmp.ne.s32.totalorder %s203_s12, 0 }
  0x51   :  { %207 = shalt.err (%p245_p2)  }
  0x52   :  { %209 = vsyncmov [#allocation2 + $0x3] }
  0x55   :  { %s210_s13 = vpop.sfrf %209 }
  0x56   :  { %p246_p3 = scmp.ne.s32.totalorder %s210_s13, 0 }
  0x58   :  { %214 = shalt.err (%p246_p3)  }
  0x59   :  { %216 = vsyncmov [#allocation2 + $0x4] }
  0x5c   :  { %s217_s16 = vpop.sfrf %216 }
  0x5d   :  { %p247_p4 = scmp.ne.s32.totalorder %s217_s16, 0 }
  0x5f   :  { %221 = shalt.err (%p247_p4)  }
  0x60   :  { %223 = vsyncmov [#allocation2 + $0x5] }
  0x63   :  { %s224_s6 = vpop.sfrf %223 }
  0x64   :  { %p248_p5 = scmp.ne.s32.totalorder %s224_s6, 0 }
  0x66   :  { %228 = shalt.err (%p248_p5)  }
  0x67   :  { %230 = vsyncmov [#allocation2 + $0x6] }
  0x6a   :  { %s231_s7 = vpop.sfrf %230 }
  0x6b   :  { %p249_p6 = scmp.ne.s32.totalorder %s231_s7, 0 }
  0x6d   :  { %235 = shalt.err (%p249_p6)  }
  0x6e   :  { %237 = vsyncmov [#allocation2 + $0x7] }
  0x71   :  { %s238_s8 = vpop.sfrf %237 }
  0x72   :  { %p250_p7 = scmp.ne.s32.totalorder %s238_s8, 0 }
  0x74   :  { %242 = shalt.err (%p250_p7)  }

</bundles_post_ra>
